<compile_context>
chip_gen: v7x
topology: tpu7x:2x2x1
jax: 0.10.0
libtpu: 0.0.40
codegen_flags: <defaults>
</compile_context>

<pallas_src>
import functools

import jax
import jax.numpy as jnp
from jax import lax
from jax.experimental import pallas as pl
from jax.experimental.pallas import tpu as pltpu


LANE = 128


def _round_up(n, m):
    return ((n + m - 1) // m) * m


# ----------------------------------------------------------------------------
# Kernel
# ----------------------------------------------------------------------------
def _protonn_kernel(x_ref, w_in_ref, b_in_ref, w_hid_ref, b_hid_ref,
                    fused_w_ref, b_out_ref, out_ref,
                    *, num_layers, matmul_dtype):
    mm = matmul_dtype  # matmul operand dtype; weights are already pre-cast

    # fc_in (NOTE: no activation after fc_in, exactly as in forward_a).
    h = jnp.dot(x_ref[...].astype(mm), w_in_ref[...],
                preferred_element_type=jnp.float32) + b_in_ref[...]

    # Hidden layers: h = sigmoid(h @ W_l + b_l).  Padded hidden lanes carry a
    # bias of -30 (set in prepare_params) -> sigmoid ~ 1e-13, so no in-kernel
    # lane masking is needed before the L2 norm.
    def layer(l, h):
        z = jnp.dot(h.astype(mm), w_hid_ref[l],
                    preferred_element_type=jnp.float32) + b_hid_ref[l]
        return jax.nn.sigmoid(z)

    h = lax.fori_loop(0, num_layers, layer, h, unroll=True)

    # Row-wise L2 normalization (X_hid.div(X_hid.norm(p=2, dim=1, keepdim=True))).
    norm_sq = jnp.sum(h * h, axis=-1, keepdims=True)
    xn = h * lax.rsqrt(jnp.maximum(norm_sq, 1e-30))

    # Fused prototype inner product + fc_out (no nonlinearity in between):
    #   logits = xn @ (proto_mat @ W_out) + b_out
    # Padded output lanes carry bias -1e30 -> exp() == 0 in the softmax.
    logits = jnp.dot(xn.astype(mm), fused_w_ref[...],
                     preferred_element_type=jnp.float32) + b_out_ref[...]

    # Softmax over the last axis (F.softmax on a 2-D tensor).  Exact divide:
    # the denominator is (TB, 1) so this is cheap and keeps row sums == 1.
    m = jnp.max(logits, axis=-1, keepdims=True)
    e = jnp.exp(logits - m)
    out_ref[...] = (e / jnp.sum(e, axis=-1, keepdims=True)).astype(out_ref.dtype)


# ----------------------------------------------------------------------------
# One-time weight preparation (call once, reuse for every forward)
# ----------------------------------------------------------------------------
def prepare_params(w_in, b_in, w_hid, b_hid, prototype, w_out, b_out,
                   *, weight_dtype=jnp.bfloat16):
    """Normalize/fuse/pad/cast the ProtoNN weights once.

    Linear weights are stored pre-transposed as (in_features, out_features),
    so the kernel computes y = x @ W + b  (== PyTorch y = x @ W_pt.T + b).
    """
    Din, H = w_in.shape
    L = w_hid.shape[0]
    P, O = w_out.shape
    assert prototype.shape == (P, H)
    assert L >= 1, "kernel assumes at least one hidden layer"

    # forward_prototype(): row-normalize the (p, d) prototype matrix, then
    # .view(1, d, p) -- a row-major memory reinterpretation, NOT a transpose.
    # Reproduced exactly with a reshape.
    pnorm = jnp.sqrt(jnp.sum(prototype * prototype, axis=1, keepdims=True))
    proto_mat = (prototype / pnorm).reshape(H, P)
    # Fold the prototype matmul into fc_out (no nonlinearity in between).
    fused_w = proto_mat @ w_out                      # (H, O), computed in f32

    Din_p, H_p, O_p = (_round_up(d, LANE) for d in (Din, H, O))

    def pad2(a, r, c, v=0.0):
        return jnp.pad(a, ((0, r - a.shape[0]), (0, c - a.shape[1])),
                       constant_values=v)

    return dict(
        # matmul operands pre-cast to weight_dtype (biases stay f32):
        w_in=pad2(w_in, Din_p, H_p).astype(weight_dtype),
        b_in=pad2(b_in, 1, H_p),
        w_hid=jnp.pad(w_hid, ((0, 0), (0, H_p - H), (0, H_p - H))
                      ).astype(weight_dtype),
        # padded hidden lanes -> bias -30 -> sigmoid ~ 1e-13 (L2-norm safe)
        b_hid=jnp.pad(b_hid, ((0, 0), (0, 0), (0, H_p - H)),
                      constant_values=-30.0),
        fused_w=pad2(fused_w, H_p, O_p).astype(weight_dtype),
        # padded output lanes -> bias -1e30 (kept in f32) -> exp() == 0
        b_out=pad2(b_out, 1, O_p, v=-1e30),
        dims=(Din, H, P, O, L),
    )


# ----------------------------------------------------------------------------
# Forward wrapper
# ----------------------------------------------------------------------------
def protonn_forward(x, params, *, batch_tile=None, single_buffer_weights=True):
    """ProtoNN.forward.  x: (B, input_dim) f32 -> softmax probs (B, output_dim)."""
    Din, H, P, O, L = params["dims"]
    B = x.shape[0]
    assert x.shape[1] == Din

    w_in, b_in, w_hid, b_hid, fused_w, b_out = (
        params[k] for k in ("w_in", "b_in", "w_hid", "b_hid", "fused_w", "b_out"))
    Din_p, H_p = w_in.shape
    O_p = fused_w.shape[1]

    # Batch tile: adapt to B (don't pad tiny batches to 128 rows); keep >= 2
    # grid steps when possible so v7x can megacore-shard the "parallel" axis.
    # For v5e, pass batch_tile=128 explicitly (128-wide MXU).
    if batch_tile is None:
        if B <= 8:
            TB = 8
        else:
            n_tiles = max(2, -(-B // 256))
            TB = _round_up(-(-B // n_tiles), 8)
    else:
        TB = batch_tile
    B_p = _round_up(max(B, 1), TB)
    grid = (B_p // TB,)

    x_p = jnp.pad(x, ((0, B_p - B), (0, Din_p - Din)))

    # VMEM budget: (single-buffered) resident weights + double-buffered
    # activation tiles + intermediates + headroom, clipped to ~80% of this
    # generation's physical VMEM (v5e/v6e: 128 MiB, v7x: 64 MiB per TC).
    try:
        cap = int(0.8 * pltpu.get_tpu_info().vmem_capacity_bytes)
    except Exception:
        cap = 48 << 20  # conservative default that also fits a v7x TensorCore
    wbytes = (w_in.dtype.itemsize * (Din_p * H_p + L * H_p * H_p + H_p * O_p)
              + 4 * (H_p + L * H_p + O_p))
    weight_bufs = 1 if single_buffer_weights else 2
    need = (weight_bufs * wbytes
            + 2 * 4 * TB * (Din_p + O_p)      # double-buffered x / out tiles
            + 4 * 4 * TB * H_p                # in-kernel intermediates
            + (8 << 20))                      # Mosaic internal scratch headroom
    vmem_limit = int(min(cap, max(need, 32 << 20)))
    # NOTE: if `need` ever exceeds `cap` (huge hidden_size / num_layers on the
    # 64 MiB v7x), stream w_hid per layer from HBM (pl.ANY + make_async_copy
    # double-buffering) instead of keeping it resident.  Not needed here.

    kernel = functools.partial(_protonn_kernel, num_layers=L,
                               matmul_dtype=w_in.dtype)

    def call(use_single_buffer):
        wkw = {}
        if use_single_buffer and hasattr(pl, "Buffered"):
            # Weights never change across the batch grid -> one VMEM buffer.
            wkw = dict(pipeline_mode=pl.Buffered(1))
        return pl.pallas_call(
            kernel,
            out_shape=jax.ShapeDtypeStruct((B_p, O_p), jnp.float32),
            grid=grid,
            in_specs=[
                pl.BlockSpec((TB, Din_p), lambda i: (i, 0)),              # x
                pl.BlockSpec((Din_p, H_p), lambda i: (0, 0), **wkw),      # w_in
                pl.BlockSpec((1, H_p), lambda i: (0, 0), **wkw),          # b_in
                pl.BlockSpec((L, H_p, H_p), lambda i: (0, 0, 0), **wkw),  # w_hid
                pl.BlockSpec((L, 1, H_p), lambda i: (0, 0, 0), **wkw),    # b_hid
                pl.BlockSpec((H_p, O_p), lambda i: (0, 0), **wkw),        # proto@W_out
                pl.BlockSpec((1, O_p), lambda i: (0, 0), **wkw),          # b_out
            ],
            out_specs=pl.BlockSpec((TB, O_p), lambda i: (i, 0)),
            compiler_params=pltpu.CompilerParams(
                dimension_semantics=("parallel",),
                vmem_limit_bytes=vmem_limit),
        )(x_p, w_in, b_in, w_hid, b_hid, fused_w, b_out)

    if single_buffer_weights:
        try:
            out_p = call(True)
        except Exception:
            # Installed Pallas rejected single-buffered weights -> default bufs.
            out_p = call(False)
    else:
        out_p = call(False)

    return out_p[:B, :O]


# ----------------------------------------------------------------------------
# Test helpers
# ----------------------------------------------------------------------------
def init_params(key, input_dim, hidden_size, num_hidden_layers, prototype_num,
                output_dim):
    """nn.Linear-style init U(-1/sqrt(fan_in), 1/sqrt(fan_in)); weights (in, out)."""
    ks = jax.random.split(key, 6)

    def u(k, shape, fan_in):
        bound = 1.0 / jnp.sqrt(jnp.float32(fan_in))
        return jax.random.uniform(k, shape, jnp.float32, -bound, bound)

    w_in = u(ks[0], (input_dim, hidden_size), input_dim)
    b_in = u(ks[1], (1, hidden_size), input_dim)
    w_hid = u(ks[2], (num_hidden_layers, hidden_size, hidden_size), hidden_size)
    b_hid = u(ks[3], (num_hidden_layers, 1, hidden_size), hidden_size)
    # ProtoNN's fc_out is Linear(prototype_num, output_dim).
    w_out = u(ks[4], (prototype_num, output_dim), prototype_num)
    b_out = u(ks[5], (1, output_dim), prototype_num)
    return w_in, b_in, w_hid, b_hid, w_out, b_out


def reference_forward(x, w_in, b_in, w_hid, b_hid, prototype, w_out, b_out):
    h = x @ w_in + b_in
    for l in range(w_hid.shape[0]):
        h = jax.nn.sigmoid(h @ w_hid[l] + b_hid[l])
    xn = h / jnp.linalg.norm(h, axis=1, keepdims=True)
    pn = prototype / jnp.linalg.norm(prototype, axis=1, keepdims=True)
    proto_mat = pn.reshape(h.shape[1], prototype.shape[0])  # == .view(1, d, p)
    inner = xn @ proto_mat
    logits = inner @ w_out + b_out
    return jax.nn.softmax(logits, axis=-1)


if __name__ == "__main__":
    # Small shapes consistent with the module's forward (2-D batch of features).
    batch = 8
    input_dim = 16
    hidden_size = 32
    num_hidden_layers = 2
    prototype_num = 10
    output_dim = 8

    key = jax.random.PRNGKey(0)
    kx, kp, kproto = jax.random.split(key, 3)
    x = jax.random.normal(kx, (batch, input_dim), jnp.float32)
    w_in, b_in, w_hid, b_hid, w_out, b_out = init_params(
        kp, input_dim, hidden_size, num_hidden_layers, prototype_num, output_dim)
    # The module would fill `prototype` via generate_prototype(); zero init would
    # divide by zero, so use deterministic random prototypes for the test.
    prototype = jax.random.normal(kproto, (prototype_num, hidden_size), jnp.float32)

    ref = reference_forward(x, w_in, b_in, w_hid, b_hid, prototype, w_out, b_out)

    # f32-weight run for a tight correctness check.
    params_f32 = prepare_params(w_in, b_in, w_hid, b_hid, prototype, w_out, b_out,
                                weight_dtype=jnp.float32)
    out = jax.block_until_ready(protonn_forward(x, params_f32))
    assert out.shape == (batch, output_dim)
    assert jnp.allclose(out, ref, atol=1e-3, rtol=1e-3)
    assert jnp.allclose(jnp.sum(out, axis=-1), 1.0, atol=1e-3)

    # Default (bf16 matmul operands) run -- looser element tolerance; row sums
    # remain exactly normalized thanks to the exact softmax divide.
    params_bf16 = prepare_params(w_in, b_in, w_hid, b_hid, prototype, w_out, b_out)
    out_bf = jax.block_until_ready(protonn_forward(x, params_bf16))
    assert out_bf.shape == (batch, output_dim)
    assert jnp.allclose(out_bf, ref, atol=5e-2, rtol=5e-2)
    assert jnp.allclose(jnp.sum(out_bf, axis=-1), 1.0, atol=1e-3)

    print("KERNEL_OK")
</pallas_src>

<mosaic_0001>
module attributes {stable_mosaic.version = 11 : i64} {
  func.func @_protonn_kernel(%arg0: i32, %arg1: memref<8x128xf32, #tpu.memory_space<vmem>>, %arg2: memref<128x128xf32, #tpu.memory_space<vmem>>, %arg3: memref<1x128xf32, #tpu.memory_space<vmem>>, %arg4: memref<2x128x128xf32, #tpu.memory_space<vmem>>, %arg5: memref<2x1x128xf32, #tpu.memory_space<vmem>>, %arg6: memref<128x128xf32, #tpu.memory_space<vmem>>, %arg7: memref<1x128xf32, #tpu.memory_space<vmem>>, %arg8: memref<8x128xf32, #tpu.memory_space<vmem>>) attributes {dimension_semantics = [#tpu.dimension_semantics<parallel>], iteration_bounds = array<i64: 1>, scalar_prefetch = 0 : i64, scratch_operands = 0 : i64, tpu.core_type = #tpu.core_type<tc>, window_params = [{transform_indices = @transform_0, window_bounds = array<i64: 8, 128>}, {pipeline_mode = #tpu.pipeline_mode<synchronous>, transform_indices = @transform_1, window_bounds = array<i64: 128, 128>}, {pipeline_mode = #tpu.pipeline_mode<synchronous>, transform_indices = @transform_2, window_bounds = array<i64: 1, 128>}, {pipeline_mode = #tpu.pipeline_mode<synchronous>, transform_indices = @transform_3, window_bounds = array<i64: 2, 128, 128>}, {pipeline_mode = #tpu.pipeline_mode<synchronous>, transform_indices = @transform_4, window_bounds = array<i64: 2, 1, 128>}, {pipeline_mode = #tpu.pipeline_mode<synchronous>, transform_indices = @transform_5, window_bounds = array<i64: 128, 128>}, {pipeline_mode = #tpu.pipeline_mode<synchronous>, transform_indices = @transform_6, window_bounds = array<i64: 1, 128>}, {transform_indices = @transform_7, window_bounds = array<i64: 8, 128>}]} {
    %c0 = arith.constant 0 : index
    %c0_0 = arith.constant 0 : index
    %0 = vector.load %arg1[%c0, %c0_0] : memref<8x128xf32, #tpu.memory_space<vmem>>, vector<8x128xf32>
    %c0_1 = arith.constant 0 : index
    %c0_2 = arith.constant 0 : index
    %1 = vector.load %arg2[%c0_1, %c0_2] : memref<128x128xf32, #tpu.memory_space<vmem>>, vector<128x128xf32>
    %cst = arith.constant dense<0.000000e+00> : vector<8x128xf32>
    %2 = tpu.matmul %0, %1, %cst {dimension_numbers = #tpu.dot_dimension_numbers<[1], [0], [0], [1], [0, 0, 1, 1], [], []>} : vector<8x128xf32>, vector<128x128xf32>, vector<8x128xf32> -> vector<8x128xf32>
    %c0_3 = arith.constant 0 : index
    %c0_4 = arith.constant 0 : index
    %3 = vector.load %arg3[%c0_3, %c0_4] : memref<1x128xf32, #tpu.memory_space<vmem>>, vector<1x128xf32>
    %4 = vector.broadcast %3 : vector<1x128xf32> to vector<8x128xf32>
    %5 = arith.addf %2, %4 : vector<8x128xf32>
    %c0_i32 = arith.constant 0 : i32
    %6 = arith.index_cast %c0_i32 : i32 to index
    %c0_5 = arith.constant 0 : index
    %c0_6 = arith.constant 0 : index
    %7 = vector.load %arg4[%6, %c0_5, %c0_6] : memref<2x128x128xf32, #tpu.memory_space<vmem>>, vector<1x128x128xf32>
    %8 = vector.shape_cast %7 : vector<1x128x128xf32> to vector<128x128xf32>
    %cst_7 = arith.constant dense<0.000000e+00> : vector<8x128xf32>
    %9 = tpu.matmul %5, %8, %cst_7 {dimension_numbers = #tpu.dot_dimension_numbers<[1], [0], [0], [1], [0, 0, 1, 1], [], []>} : vector<8x128xf32>, vector<128x128xf32>, vector<8x128xf32> -> vector<8x128xf32>
    %10 = arith.index_cast %c0_i32 : i32 to index
    %c0_8 = arith.constant 0 : index
    %c0_9 = arith.constant 0 : index
    %11 = vector.load %arg5[%10, %c0_8, %c0_9] : memref<2x1x128xf32, #tpu.memory_space<vmem>>, vector<1x1x128xf32>
    %12 = vector.shape_cast %11 : vector<1x1x128xf32> to vector<1x128xf32>
    %13 = vector.broadcast %12 : vector<1x128xf32> to vector<8x128xf32>
    %14 = arith.addf %9, %13 : vector<8x128xf32>
    %15 = arith.negf %14 : vector<8x128xf32>
    %16 = math.exp %15 : vector<8x128xf32>
    %cst_10 = arith.constant 1.000000e+00 : f32
    %17 = vector.broadcast %cst_10 : f32 to vector<8x128xf32>
    %18 = arith.addf %17, %16 : vector<8x128xf32>
    %19 = arith.divf %17, %18 : vector<8x128xf32>
    %c1_i32 = arith.constant 1 : i32
    %20 = arith.index_cast %c1_i32 : i32 to index
    %c0_11 = arith.constant 0 : index
    %c0_12 = arith.constant 0 : index
    %21 = vector.load %arg4[%20, %c0_11, %c0_12] : memref<2x128x128xf32, #tpu.memory_space<vmem>>, vector<1x128x128xf32>
    %22 = vector.shape_cast %21 : vector<1x128x128xf32> to vector<128x128xf32>
    %cst_13 = arith.constant dense<0.000000e+00> : vector<8x128xf32>
    %23 = tpu.matmul %19, %22, %cst_13 {dimension_numbers = #tpu.dot_dimension_numbers<[1], [0], [0], [1], [0, 0, 1, 1], [], []>} : vector<8x128xf32>, vector<128x128xf32>, vector<8x128xf32> -> vector<8x128xf32>
    %24 = arith.index_cast %c1_i32 : i32 to index
    %c0_14 = arith.constant 0 : index
    %c0_15 = arith.constant 0 : index
    %25 = vector.load %arg5[%24, %c0_14, %c0_15] : memref<2x1x128xf32, #tpu.memory_space<vmem>>, vector<1x1x128xf32>
    %26 = vector.shape_cast %25 : vector<1x1x128xf32> to vector<1x128xf32>
    %27 = vector.broadcast %26 : vector<1x128xf32> to vector<8x128xf32>
    %28 = arith.addf %23, %27 : vector<8x128xf32>
    %29 = arith.negf %28 : vector<8x128xf32>
    %30 = math.exp %29 : vector<8x128xf32>
    %cst_16 = arith.constant 1.000000e+00 : f32
    %31 = vector.broadcast %cst_16 : f32 to vector<8x128xf32>
    %32 = arith.addf %31, %30 : vector<8x128xf32>
    %33 = arith.divf %31, %32 : vector<8x128xf32>
    %c2_i32 = arith.constant 2 : i32
    %34 = arith.mulf %33, %33 : vector<8x128xf32>
    %cst_17 = arith.constant dense<0.000000e+00> : vector<8xf32>
    %35 = vector.multi_reduction <add>, %34, %cst_17 [1] : vector<8x128xf32> to vector<8xf32>
    %36 = vector.shape_cast %35 : vector<8xf32> to vector<8x1xf32>
    %cst_18 = arith.constant 1.000000e-30 : f32
    %37 = vector.broadcast %cst_18 : f32 to vector<8x1xf32>
    %38 = arith.maximumf %36, %37 : vector<8x1xf32>
    %39 = math.rsqrt %38 : vector<8x1xf32>
    %40 = vector.broadcast %39 : vector<8x1xf32> to vector<8x128xf32>
    %41 = arith.mulf %33, %40 : vector<8x128xf32>
    %c0_19 = arith.constant 0 : index
    %c0_20 = arith.constant 0 : index
    %42 = vector.load %arg6[%c0_19, %c0_20] : memref<128x128xf32, #tpu.memory_space<vmem>>, vector<128x128xf32>
    %cst_21 = arith.constant dense<0.000000e+00> : vector<8x128xf32>
    %43 = tpu.matmul %41, %42, %cst_21 {dimension_numbers = #tpu.dot_dimension_numbers<[1], [0], [0], [1], [0, 0, 1, 1], [], []>} : vector<8x128xf32>, vector<128x128xf32>, vector<8x128xf32> -> vector<8x128xf32>
    %c0_22 = arith.constant 0 : index
    %c0_23 = arith.constant 0 : index
    %44 = vector.load %arg7[%c0_22, %c0_23] : memref<1x128xf32, #tpu.memory_space<vmem>>, vector<1x128xf32>
    %45 = vector.broadcast %44 : vector<1x128xf32> to vector<8x128xf32>
    %46 = arith.addf %43, %45 : vector<8x128xf32>
    %cst_24 = arith.constant dense<0xFF800000> : vector<8xf32>
    %47 = vector.multi_reduction <maximumf>, %46, %cst_24 [1] : vector<8x128xf32> to vector<8xf32>
    %48 = vector.shape_cast %47 : vector<8xf32> to vector<8x1xf32>
    %49 = vector.broadcast %48 : vector<8x1xf32> to vector<8x128xf32>
    %50 = arith.subf %46, %49 : vector<8x128xf32>
    %51 = math.exp %50 : vector<8x128xf32>
    %cst_25 = arith.constant dense<0.000000e+00> : vector<8xf32>
    %52 = vector.multi_reduction <add>, %51, %cst_25 [1] : vector<8x128xf32> to vector<8xf32>
    %53 = vector.shape_cast %52 : vector<8xf32> to vector<8x1xf32>
    %54 = vector.broadcast %53 : vector<8x1xf32> to vector<8x128xf32>
    %55 = arith.divf %51, %54 : vector<8x128xf32>
    %c0_26 = arith.constant 0 : index
    %c0_27 = arith.constant 0 : index
    %56 = vector.load %arg8[%c0_26, %c0_27] : memref<8x128xf32, #tpu.memory_space<vmem>>, vector<8x128xf32>
    tpu.vector_store %arg8[%c0_26, %c0_27], %55 {strides = array<i32>} : memref<8x128xf32, #tpu.memory_space<vmem>>, vector<8x128xf32>,
    return
  }
  func.func @transform_0(%arg0: i32) -> (i32, i32) {
    %c0_i32 = arith.constant 0 : i32
    %c0_i32_0 = arith.constant 0 : i32
    return %arg0, %c0_i32 : i32, i32
  }
  func.func @transform_1(%arg0: i32) -> (i32, i32) {
    %c0_i32 = arith.constant 0 : i32
    %c0_i32_0 = arith.constant 0 : i32
    %c0_i32_1 = arith.constant 0 : i32
    return %c0_i32, %c0_i32_0 : i32, i32
  }
  func.func @transform_2(%arg0: i32) -> (i32, i32) {
    %c0_i32 = arith.constant 0 : i32
    %c0_i32_0 = arith.constant 0 : i32
    %c0_i32_1 = arith.constant 0 : i32
    return %c0_i32, %c0_i32_0 : i32, i32
  }
  func.func @transform_3(%arg0: i32) -> (i32, i32, i32) {
    %c0_i32 = arith.constant 0 : i32
    %c0_i32_0 = arith.constant 0 : i32
    %c0_i32_1 = arith.constant 0 : i32
    %c0_i32_2 = arith.constant 0 : i32
    return %c0_i32, %c0_i32_0, %c0_i32_1 : i32, i32, i32
  }
  func.func @transform_4(%arg0: i32) -> (i32, i32, i32) {
    %c0_i32 = arith.constant 0 : i32
    %c0_i32_0 = arith.constant 0 : i32
    %c0_i32_1 = arith.constant 0 : i32
    %c0_i32_2 = arith.constant 0 : i32
    return %c0_i32, %c0_i32_0, %c0_i32_1 : i32, i32, i32
  }
  func.func @transform_5(%arg0: i32) -> (i32, i32) {
    %c0_i32 = arith.constant 0 : i32
    %c0_i32_0 = arith.constant 0 : i32
    %c0_i32_1 = arith.constant 0 : i32
    return %c0_i32, %c0_i32_0 : i32, i32
  }
  func.func @transform_6(%arg0: i32) -> (i32, i32) {
    %c0_i32 = arith.constant 0 : i32
    %c0_i32_0 = arith.constant 0 : i32
    %c0_i32_1 = arith.constant 0 : i32
    return %c0_i32, %c0_i32_0 : i32, i32
  }
  func.func @transform_7(%arg0: i32) -> (i32, i32) {
    %c0_i32 = arith.constant 0 : i32
    %c0_i32_0 = arith.constant 0 : i32
    return %arg0, %c0_i32 : i32, i32
  }
}

module attributes {stable_mosaic.version = 11 : i64} {
  func.func @_protonn_kernel(%arg0: i32, %arg1: memref<8x128xf32, #tpu.memory_space<vmem>>, %arg2: memref<128x128xf32, #tpu.memory_space<vmem>>, %arg3: memref<1x128xf32, #tpu.memory_space<vmem>>, %arg4: memref<2x128x128xf32, #tpu.memory_space<vmem>>, %arg5: memref<2x1x128xf32, #tpu.memory_space<vmem>>, %arg6: memref<128x128xf32, #tpu.memory_space<vmem>>, %arg7: memref<1x128xf32, #tpu.memory_space<vmem>>, %arg8: memref<8x128xf32, #tpu.memory_space<vmem>>) attributes {dimension_semantics = [#tpu.dimension_semantics<parallel>], iteration_bounds = array<i64: 1>, scalar_prefetch = 0 : i64, scratch_operands = 0 : i64, tpu.core_type = #tpu.core_type<tc>, window_params = [{transform_indices = @transform_0, window_bounds = array<i64: 8, 128>}, {pipeline_mode = #tpu.pipeline_mode<synchronous>, transform_indices = @transform_1, window_bounds = array<i64: 128, 128>}, {pipeline_mode = #tpu.pipeline_mode<synchronous>, transform_indices = @transform_2, window_bounds = array<i64: 1, 128>}, {pipeline_mode = #tpu.pipeline_mode<synchronous>, transform_indices = @transform_3, window_bounds = array<i64: 2, 128, 128>}, {pipeline_mode = #tpu.pipeline_mode<synchronous>, transform_indices = @transform_4, window_bounds = array<i64: 2, 1, 128>}, {pipeline_mode = #tpu.pipeline_mode<synchronous>, transform_indices = @transform_5, window_bounds = array<i64: 128, 128>}, {pipeline_mode = #tpu.pipeline_mode<synchronous>, transform_indices = @transform_6, window_bounds = array<i64: 1, 128>}, {transform_indices = @transform_7, window_bounds = array<i64: 8, 128>}]} {
    %c0 = arith.constant 0 : index
    %c0_0 = arith.constant 0 : index
    %0 = vector.load %arg1[%c0, %c0_0] : memref<8x128xf32, #tpu.memory_space<vmem>>, vector<8x128xf32>
    %c0_1 = arith.constant 0 : index
    %c0_2 = arith.constant 0 : index
    %1 = vector.load %arg2[%c0_1, %c0_2] : memref<128x128xf32, #tpu.memory_space<vmem>>, vector<128x128xf32>
    %cst = arith.constant dense<0.000000e+00> : vector<8x128xf32>
    %2 = tpu.matmul %0, %1, %cst {dimension_numbers = #tpu.dot_dimension_numbers<[1], [0], [0], [1], [0, 0, 1, 1], [], []>} : vector<8x128xf32>, vector<128x128xf32>, vector<8x128xf32> -> vector<8x128xf32>
    %c0_3 = arith.constant 0 : index
    %c0_4 = arith.constant 0 : index
    %3 = vector.load %arg3[%c0_3, %c0_4] : memref<1x128xf32, #tpu.memory_space<vmem>>, vector<1x128xf32>
    %4 = vector.broadcast %3 : vector<1x128xf32> to vector<8x128xf32>
    %5 = arith.addf %2, %4 : vector<8x128xf32>
    %c0_i32 = arith.constant 0 : i32
    %6 = arith.index_cast %c0_i32 : i32 to index
    %c0_5 = arith.constant 0 : index
    %c0_6 = arith.constant 0 : index
    %7 = vector.load %arg4[%6, %c0_5, %c0_6] : memref<2x128x128xf32, #tpu.memory_space<vmem>>, vector<1x128x128xf32>
    %8 = vector.shape_cast %7 : vector<1x128x128xf32> to vector<128x128xf32>
    %cst_7 = arith.constant dense<0.000000e+00> : vector<8x128xf32>
    %9 = tpu.matmul %5, %8, %cst_7 {dimension_numbers = #tpu.dot_dimension_numbers<[1], [0], [0], [1], [0, 0, 1, 1], [], []>} : vector<8x128xf32>, vector<128x128xf32>, vector<8x128xf32> -> vector<8x128xf32>
    %10 = arith.index_cast %c0_i32 : i32 to index
    %c0_8 = arith.constant 0 : index
    %c0_9 = arith.constant 0 : index
    %11 = vector.load %arg5[%10, %c0_8, %c0_9] : memref<2x1x128xf32, #tpu.memory_space<vmem>>, vector<1x1x128xf32>
    %12 = vector.shape_cast %11 : vector<1x1x128xf32> to vector<1x128xf32>
    %13 = vector.broadcast %12 : vector<1x128xf32> to vector<8x128xf32>
    %14 = arith.addf %9, %13 : vector<8x128xf32>
    %15 = arith.negf %14 : vector<8x128xf32>
    %16 = math.exp %15 : vector<8x128xf32>
    %cst_10 = arith.constant 1.000000e+00 : f32
    %17 = vector.broadcast %cst_10 : f32 to vector<8x128xf32>
    %18 = arith.addf %17, %16 : vector<8x128xf32>
    %19 = arith.divf %17, %18 : vector<8x128xf32>
    %c1_i32 = arith.constant 1 : i32
    %20 = arith.index_cast %c1_i32 : i32 to index
    %c0_11 = arith.constant 0 : index
    %c0_12 = arith.constant 0 : index
    %21 = vector.load %arg4[%20, %c0_11, %c0_12] : memref<2x128x128xf32, #tpu.memory_space<vmem>>, vector<1x128x128xf32>
    %22 = vector.shape_cast %21 : vector<1x128x128xf32> to vector<128x128xf32>
    %cst_13 = arith.constant dense<0.000000e+00> : vector<8x128xf32>
    %23 = tpu.matmul %19, %22, %cst_13 {dimension_numbers = #tpu.dot_dimension_numbers<[1], [0], [0], [1], [0, 0, 1, 1], [], []>} : vector<8x128xf32>, vector<128x128xf32>, vector<8x128xf32> -> vector<8x128xf32>
    %24 = arith.index_cast %c1_i32 : i32 to index
    %c0_14 = arith.constant 0 : index
    %c0_15 = arith.constant 0 : index
    %25 = vector.load %arg5[%24, %c0_14, %c0_15] : memref<2x1x128xf32, #tpu.memory_space<vmem>>, vector<1x1x128xf32>
    %26 = vector.shape_cast %25 : vector<1x1x128xf32> to vector<1x128xf32>
    %27 = vector.broadcast %26 : vector<1x128xf32> to vector<8x128xf32>
    %28 = arith.addf %23, %27 : vector<8x128xf32>
    %29 = arith.negf %28 : vector<8x128xf32>
    %30 = math.exp %29 : vector<8x128xf32>
    %cst_16 = arith.constant 1.000000e+00 : f32
    %31 = vector.broadcast %cst_16 : f32 to vector<8x128xf32>
    %32 = arith.addf %31, %30 : vector<8x128xf32>
    %33 = arith.divf %31, %32 : vector<8x128xf32>
    %c2_i32 = arith.constant 2 : i32
    %34 = arith.mulf %33, %33 : vector<8x128xf32>
    %cst_17 = arith.constant dense<0.000000e+00> : vector<8xf32>
    %35 = vector.multi_reduction <add>, %34, %cst_17 [1] : vector<8x128xf32> to vector<8xf32>
    %36 = vector.shape_cast %35 : vector<8xf32> to vector<8x1xf32>
    %cst_18 = arith.constant 1.000000e-30 : f32
    %37 = vector.broadcast %cst_18 : f32 to vector<8x1xf32>
    %38 = arith.maximumf %36, %37 : vector<8x1xf32>
    %39 = math.rsqrt %38 : vector<8x1xf32>
    %40 = vector.broadcast %39 : vector<8x1xf32> to vector<8x128xf32>
    %41 = arith.mulf %33, %40 : vector<8x128xf32>
    %c0_19 = arith.constant 0 : index
    %c0_20 = arith.constant 0 : index
    %42 = vector.load %arg6[%c0_19, %c0_20] : memref<128x128xf32, #tpu.memory_space<vmem>>, vector<128x128xf32>
    %cst_21 = arith.constant dense<0.000000e+00> : vector<8x128xf32>
    %43 = tpu.matmul %41, %42, %cst_21 {dimension_numbers = #tpu.dot_dimension_numbers<[1], [0], [0], [1], [0, 0, 1, 1], [], []>} : vector<8x128xf32>, vector<128x128xf32>, vector<8x128xf32> -> vector<8x128xf32>
    %c0_22 = arith.constant 0 : index
    %c0_23 = arith.constant 0 : index
    %44 = vector.load %arg7[%c0_22, %c0_23] : memref<1x128xf32, #tpu.memory_space<vmem>>, vector<1x128xf32>
    %45 = vector.broadcast %44 : vector<1x128xf32> to vector<8x128xf32>
    %46 = arith.addf %43, %45 : vector<8x128xf32>
    %cst_24 = arith.constant dense<0xFF800000> : vector<8xf32>
    %47 = vector.multi_reduction <maximumf>, %46, %cst_24 [1] : vector<8x128xf32> to vector<8xf32>
    %48 = vector.shape_cast %47 : vector<8xf32> to vector<8x1xf32>
    %49 = vector.broadcast %48 : vector<8x1xf32> to vector<8x128xf32>
    %50 = arith.subf %46, %49 : vector<8x128xf32>
    %51 = math.exp %50 : vector<8x128xf32>
    %cst_25 = arith.constant dense<0.000000e+00> : vector<8xf32>
    %52 = vector.multi_reduction <add>, %51, %cst_25 [1] : vector<8x128xf32> to vector<8xf32>
    %53 = vector.shape_cast %52 : vector<8xf32> to vector<8x1xf32>
    %54 = vector.broadcast %53 : vector<8x1xf32> to vector<8x128xf32>
    %55 = arith.divf %51, %54 : vector<8x128xf32>
    %c0_26 = arith.constant 0 : index
    %c0_27 = arith.constant 0 : index
    %56 = vector.load %arg8[%c0_26, %c0_27] : memref<8x128xf32, #tpu.memory_space<vmem>>, vector<8x128xf32>
    tpu.vector_store %arg8[%c0_26, %c0_27], %55 {strides = array<i32>} : memref<8x128xf32, #tpu.memory_space<vmem>>, vector<8x128xf32>,
    return
  }
  func.func @transform_0(%arg0: i32) -> (i32, i32) {
    %c0_i32 = arith.constant 0 : i32
    %c0_i32_0 = arith.constant 0 : i32
    return %arg0, %c0_i32 : i32, i32
  }
  func.func @transform_1(%arg0: i32) -> (i32, i32) {
    %c0_i32 = arith.constant 0 : i32
    %c0_i32_0 = arith.constant 0 : i32
    %c0_i32_1 = arith.constant 0 : i32
    return %c0_i32, %c0_i32_0 : i32, i32
  }
  func.func @transform_2(%arg0: i32) -> (i32, i32) {
    %c0_i32 = arith.constant 0 : i32
    %c0_i32_0 = arith.constant 0 : i32
    %c0_i32_1 = arith.constant 0 : i32
    return %c0_i32, %c0_i32_0 : i32, i32
  }
  func.func @transform_3(%arg0: i32) -> (i32, i32, i32) {
    %c0_i32 = arith.constant 0 : i32
    %c0_i32_0 = arith.constant 0 : i32
    %c0_i32_1 = arith.constant 0 : i32
    %c0_i32_2 = arith.constant 0 : i32
    return %c0_i32, %c0_i32_0, %c0_i32_1 : i32, i32, i32
  }
  func.func @transform_4(%arg0: i32) -> (i32, i32, i32) {
    %c0_i32 = arith.constant 0 : i32
    %c0_i32_0 = arith.constant 0 : i32
    %c0_i32_1 = arith.constant 0 : i32
    %c0_i32_2 = arith.constant 0 : i32
    return %c0_i32, %c0_i32_0, %c0_i32_1 : i32, i32, i32
  }
  func.func @transform_5(%arg0: i32) -> (i32, i32) {
    %c0_i32 = arith.constant 0 : i32
    %c0_i32_0 = arith.constant 0 : i32
    %c0_i32_1 = arith.constant 0 : i32
    return %c0_i32, %c0_i32_0 : i32, i32
  }
  func.func @transform_6(%arg0: i32) -> (i32, i32) {
    %c0_i32 = arith.constant 0 : i32
    %c0_i32_0 = arith.constant 0 : i32
    %c0_i32_1 = arith.constant 0 : i32
    return %c0_i32, %c0_i32_0 : i32, i32
  }
  func.func @transform_7(%arg0: i32) -> (i32, i32) {
    %c0_i32 = arith.constant 0 : i32
    %c0_i32_0 = arith.constant 0 : i32
    return %arg0, %c0_i32 : i32, i32
  }
}

</mosaic_0001>

<bundles_post_ra>
// kernel: tpu_custom_call.1
= control target key start
LH: loop header
LB: loop body
LE: loop exit
PB: predicated region body
PF: predicated region fallthrough
CT: control target
= control target key end

     0   :  { %12 = vsyncpa [#allocation3], 0  ;;  %s1124_s0 = inlined_call_operand.hbm [shape: f32[8,128], index: 0, kind: input, shape index: {}]   ;;  %s1125_s1 = inlined_call_operand.hbm [shape: f32[128,128], index: 1, kind: input, shape index: {}]   ;;  %s1126_s2 = inlined_call_operand.vmem [shape: f32[1,128], index: 2, kind: input, shape index: {}]   ;;  %s1127_s3 = inlined_call_operand.hbm [shape: f32[2,128,128], index: 3, kind: input, shape index: {}]   ;;  %s1128_s4 = inlined_call_operand.vmem [shape: f32[2,1,128], index: 4, kind: input, shape index: {}]   ;;  %s1129_s5 = inlined_call_operand.hbm [shape: f32[128,128], index: 5, kind: input, shape index: {}]   ;;  %s1130_s6 = inlined_call_operand.vmem [shape: f32[1,128], index: 6, kind: input, shape index: {}]   ;;  %s1131_s7 = inlined_call_operand.hbm [shape: f32[8,128], index: 7, kind: output, shape index: {}]  }
   0x1   :  { %13 = vsyncpa [#allocation6], 0 }
   0x2   :  { %14 = vsyncpa [#allocation9], 0 }
   0x3   :  { %15 = vsyncpa [#allocation4], 0  ;;  %s953_s24 = smov [#allocation5]   ;;  %s835_s28 = scalar_lea.hbm %s1125_s1, 2048 }
   0x4   :  { %s31_s25 = sshll.u32 %s953_s24, 4  ;;  %p836_p0 = scmp.ne.s32.totalorder %s1125_s1, %s835_s28  ;;  %s32_s25 = int_to_ptr.vmem [resolvable:$true] %s31_s25 }
   0x5   :  { %p839_p1 = scmp.lt.u32.totalorder %s835_s28, %s1125_s1 }
   0x7   :  { %p841_p2 = pnand %p839_p1, %p836_p0 }
   0x9   :  { %844 = shalt.err (!%p841_p2)
}
   0xa   :  { %s845_s10 = scalar_lea.vmem %s32_s25, 2048  ;;  %p850_p4 = scmp.lt.s32.totalorder %s32_s25, %s32_s25 }
   0xb   :  { %p846_p3 = scmp.ne.s32.totalorder %s32_s25, %s845_s10  ;;  %p851_p5 = scmp.lt.s32.totalorder %s845_s10, %s845_s10 }
   0xd   :  { %p852_p6 = por %p851_p5, %p850_p4 }
   0xf   :  { %p853_p7 = pnand %p852_p6, %p846_p3 }
  0x11   :  { %856 = shalt.err (!%p853_p7)
}
  0x12   :  { %s954_s11 = smov 128   ;;  %s955_s12 = smov 8  }
  0x13   :  { %37 = dma.hbm_to_vmem [thread:$0]  %s1125_s1, 2048, %s32_s25, [#allocation6], %s954_s11, %s954_s11, %s955_s12  }
  0x14   :  { %s956_s15 = smov [#allocation2]   ;;  %s957_s17 = smov [#allocation7]  }
  0x15   :  { %s22_s16 = sshll.u32 %s956_s15, 4  ;;  %s45_s18 = sshll.u32 %s957_s17, 4  ;;  %s23_s16 = int_to_ptr.vmem [resolvable:$true] %s22_s16  ;;  %s46_s18 = int_to_ptr.vmem [resolvable:$true] %s45_s18 }
  0x16   :  { %s857_s21 = scalar_lea.hbm %s1124_s0, 128 }
  0x17   :  { %p858_p8 = scmp.ne.s32.totalorder %s1124_s0, %s857_s21  ;;  %p861_p9 = scmp.lt.u32.totalorder %s857_s21, %s1124_s0 }
  0x19   :  { %p863_p10 = pnand %p861_p9, %p858_p8 }
  0x1b   :  { %866 = shalt.err (!%p863_p10)
}
  0x1c   :  { %s867_s1 = scalar_lea.vmem %s23_s16, 128  ;;  %p872_p12 = scmp.lt.s32.totalorder %s23_s16, %s23_s16 }
  0x1d   :  { %p868_p11 = scmp.ne.s32.totalorder %s23_s16, %s867_s1  ;;  %p873_p13 = scmp.lt.s32.totalorder %s867_s1, %s867_s1 }
  0x1f   :  { %p874_p0 = por %p873_p13, %p872_p12 }
  0x21   :  { %p875_p1 = pnand %p874_p0, %p868_p11 }
  0x23   :  { %878 = shalt.err (!%p875_p1)
}
  0x24   :  { %25 = dma.hbm_to_vmem [thread:$0]  %s1124_s0, 128, %s23_s16, [#allocation3]  }
  0x25   :  { %s879_s30 = scalar_lea.hbm %s1127_s3, 4096 }
  0x26   :  { %p880_p2 = scmp.ne.s32.totalorder %s1127_s3, %s879_s30  ;;  %p883_p3 = scmp.lt.u32.totalorder %s879_s30, %s1127_s3 }
  0x28   :  { %p885_p4 = pnand %p883_p3, %p880_p2 }
  0x2a   :  { %888 = shalt.err (!%p885_p4)
}
  0x2b   :  { %s889_s14 = scalar_lea.vmem %s46_s18, 4096  ;;  %p894_p6 = scmp.lt.s32.totalorder %s46_s18, %s46_s18 }
  0x2c   :  { %p890_p5 = scmp.ne.s32.totalorder %s46_s18, %s889_s14  ;;  %p895_p7 = scmp.lt.s32.totalorder %s889_s14, %s889_s14 }
  0x2e   :  { %p896_p8 = por %p895_p7, %p894_p6 }
  0x30   :  { %p897_p9 = pnand %p896_p8, %p890_p5 }
  0x32   :  { %900 = shalt.err (!%p897_p9)
}
  0x33   :  { %51 = dma.hbm_to_vmem [thread:$0]  %s1127_s3, 4096, %s46_s18, [#allocation6], %s954_s11, %s954_s11, %s955_s12  }
  0x34   :  { %s958_s16 = smov [#allocation8]   ;;  %s901_s21 = scalar_lea.hbm %s1129_s5, 2048 }
  0x35   :  { %s59_s17 = sshll.u32 %s958_s16, 4  ;;  %p902_p10 = scmp.ne.s32.totalorder %s1129_s5, %s901_s21  ;;  %s60_s17 = int_to_ptr.vmem [resolvable:$true] %s59_s17 }
  0x36   :  { %p905_p11 = scmp.lt.u32.totalorder %s901_s21, %s1129_s5 }
  0x38   :  { %p907_p12 = pnand %p905_p11, %p902_p10 }
  0x3a   :  { %910 = shalt.err (!%p907_p12)
}
  0x3b   :  { %s911_s1 = scalar_lea.vmem %s60_s17, 2048  ;;  %p916_p0 = scmp.lt.s32.totalorder %s60_s17, %s60_s17 }
  0x3c   :  { %p912_p13 = scmp.ne.s32.totalorder %s60_s17, %s911_s1  ;;  %p917_p1 = scmp.lt.s32.totalorder %s911_s1, %s911_s1 }
  0x3e   :  { %p918_p2 = por %p917_p1, %p916_p0 }
  0x40   :  { %p919_p3 = pnand %p918_p2, %p912_p13 }
  0x42   :  { %922 = shalt.err (!%p919_p3)
}
  0x43   :  { %65 = dma.hbm_to_vmem [thread:$0]  %s1129_s5, 2048, %s60_s17, [#allocation9], %s954_s11, %s954_s11, %s955_s12  }
  0x44   :  { %945 = dma.done.wait [#allocation3], 128  }
  0x45   :  { %946 = vsyncadd [#allocation3], 4294967168 }
  0x46   :  { %947 = dma.done.wait [#allocation6], 6144  }
  0x47   :  { %948 = vsyncadd [#allocation6], 4294961152 }
  0x48   :  { %949 = dma.done.wait [#allocation9], 2048  }
  0x49   :  { %950 = vsyncadd [#allocation9], 4294965248  ;;  %v959_v0 = vmov 0.0|0.0   ;;  %vm960_vm0 = vmmov 0   ;;  %v961_v1 = vmov 0.0   ;;  %v81_v2 = vld [vmem:[#allocation5] sm:$0xff] }
  0x4a   :  { %715 = vmatprep.subr.bf16.mxu0 %v959_v0  ;;  %607 = vmatprep.mubr.msk.f32.mxu0 %vm960_vm0, %v961_v1  ;;  %v82_v3 = vld [vmem:[#allocation5 + $0x8] sm:$0xff]  ;;  %v83_v4 = vld [vmem:[#allocation5 + $0x10] sm:$0xff]  ;;  %v84_v6 = vld [vmem:[#allocation5 + $0x18] sm:$0xff]  ;;  %s962_s29 = smov [#allocation10]  }
  0x4b   :  { %739 = vmatprep.subr.bf16.mxu1 %v959_v0  ;;  %642 = vmatprep.mubr.msk.f32.mxu1 %vm960_vm0, %v961_v1  ;;  %v716_v5 = vpack.c.bf16 %v82_v3, %v81_v2  ;;  %v719_v7 = vpack.c.bf16 %v84_v6, %v83_v4  ;;  %v85_v8 = vld [vmem:[#allocation5 + $0x20] sm:$0xff]  ;;  %v86_v9 = vld [vmem:[#allocation5 + $0x28] sm:$0xff]  ;;  %v176_v12 = vld [vmem:[#allocation7 + $0x10] sm:$0xff]  ;;  %s489_s30 = sshll.u32 %s962_s29, 4  ;;  %s490_s30 = int_to_ptr.vmem [resolvable:$true] %s489_s30 }
  0x4c   :  { %v174_v10 = vld [vmem:[#allocation7] sm:$0xff]  ;;  %v175_v11 = vld [vmem:[#allocation7 + $0x8] sm:$0xff]  ;;  %v177_v13 = vld [vmem:[#allocation7 + $0x18] sm:$0xff]  ;;  %v722_v14 = vpack.c.bf16 %v86_v9, %v85_v8  ;;  %s923_s8 = scalar_lea.vmem %s490_s30, 128  ;;  %p928_p5 = scmp.lt.s32.totalorder %s490_s30, %s490_s30 }
  0x4d   :  { %717 = vmatpush3.bf16.msra.mxu0 %v716_v5  ;;  %v740_v15 = vpack.c.bf16 %v175_v11, %v174_v10  ;;  %v87_v16 = vld [vmem:[#allocation5 + $0x30] sm:$0xff]  ;;  %v88_v17 = vld [vmem:[#allocation5 + $0x38] sm:$0xff]  ;;  %v743_v18 = vpack.c.bf16 %v177_v13, %v176_v12  ;;  %v178_v19 = vld [vmem:[#allocation7 + $0x20] sm:$0xff]  ;;  %p924_p4 = scmp.ne.s32.totalorder %s490_s30, %s923_s8  ;;  %p929_p6 = scmp.lt.s32.totalorder %s923_s8, %s923_s8 }
  0x4e   :  { %718 = vmatprep.subr.bf16.mxu0 %v959_v0  ;;  %v179_v20 = vld [vmem:[#allocation7 + $0x28] sm:$0xff]  ;;  %v725_v21 = vpack.c.bf16 %v88_v17, %v87_v16  ;;  %v89_v22 = vld [vmem:[#allocation5 + $0x40] sm:$0xff]  ;;  %v180_v25 = vld [vmem:[#allocation7 + $0x30] sm:$0xff] }
  0x4f   :  { %741 = vmatpush3.bf16.msra.mxu1 %v740_v15  ;;  %v90_v23 = vld [vmem:[#allocation5 + $0x48] sm:$0xff]  ;;  %v746_v24 = vpack.c.bf16 %v179_v20, %v178_v19  ;;  %v181_v26 = vld [vmem:[#allocation7 + $0x38] sm:$0xff]  ;;  %v91_v28 = vld [vmem:[#allocation5 + $0x50] sm:$0xff]  ;;  %p930_p7 = por %p929_p6, %p928_p5 }
  0x50   :  { %742 = vmatprep.subr.bf16.mxu1 %v959_v0  ;;  %v728_v27 = vpack.c.bf16 %v90_v23, %v89_v22  ;;  %v92_v29 = vld [vmem:[#allocation5 + $0x58] sm:$0xff]  ;;  %v749_v30 = vpack.c.bf16 %v181_v26, %v180_v25  ;;  %v182_v31 = vld [vmem:[#allocation7 + $0x40] sm:$0xff]  ;;  %v183_v32 = vld [vmem:[#allocation7 + $0x48] sm:$0xff] }
  0x51   :  { %720 = vmatpush3.bf16.msra.mxu0 %v719_v7  ;;  %v731_v33 = vpack.c.bf16 %v92_v29, %v91_v28  ;;  %v93_v34 = vld [vmem:[#allocation5 + $0x60] sm:$0xff]  ;;  %v94_v35 = vld [vmem:[#allocation5 + $0x68] sm:$0xff]  ;;  %v752_v36 = vpack.c.bf16 %v183_v32, %v182_v31  ;;  %v184_v37 = vld [vmem:[#allocation7 + $0x50] sm:$0xff]  ;;  %p931_p8 = pnand %p930_p7, %p924_p4 }
  0x52   :  { %721 = vmatprep.subr.bf16.mxu0 %v959_v0  ;;  %v185_v38 = vld [vmem:[#allocation7 + $0x58] sm:$0xff]  ;;  %v734_v39 = vpack.c.bf16 %v94_v35, %v93_v34  ;;  %v95_v40 = vld [vmem:[#allocation5 + $0x70] sm:$0xff]  ;;  %v186_v43 = vld [vmem:[#allocation7 + $0x60] sm:$0xff] }
  0x53   :  { %744 = vmatpush3.bf16.msra.mxu1 %v743_v18  ;;  %v96_v41 = vld [vmem:[#allocation5 + $0x78] sm:$0xff]  ;;  %v755_v42 = vpack.c.bf16 %v185_v38, %v184_v37  ;;  %v187_v44 = vld [vmem:[#allocation7 + $0x68] sm:$0xff]  ;;  %v188_v48 = vld [vmem:[#allocation7 + $0x70] sm:$0xff] }
  0x54   :  { %745 = vmatprep.subr.bf16.mxu1 %v959_v0  ;;  %v737_v45 = vpack.c.bf16 %v96_v41, %v95_v40  ;;  %v758_v46 = vpack.c.bf16 %v187_v44, %v186_v43  ;;  %v80_v47 = vld [vmem:[#allocation2] sm:$0xff]  ;;  %v274_v51 = vld [vmem:[#allocation7 + $0x80] sm:$0xff]  ;;  %v275_v52 = vld [vmem:[#allocation7 + $0x88] sm:$0xff] }
  0x55   :  { %723 = vmatpush3.bf16.msra.mxu0 %v722_v14  ;;  %v189_v49 = vld [vmem:[#allocation7 + $0x78] sm:$0xff]  ;;  %v764_v53 = vpack.c.bf16 %v275_v52, %v274_v51  ;;  %v276_v58 = vld [vmem:[#allocation7 + $0x90] sm:$0xff]  ;;  %v278_v61 = vld [vmem:[#allocation7 + $0xa0] sm:$0xff] }
  0x56   :  { %724 = vmatprep.subr.bf16.mxu0 %v959_v0  ;;  %v761_v50 = vpack.c.bf16 %v189_v49, %v188_v48  ;;  %v500_v54 = vld [vmem:[%s1126_s2] ss:$0 sm:$0xff]  ;;  %v279_v62 = vld [vmem:[#allocation7 + $0xa8] sm:$0xff]  ;;  %v280_v2 = vld [vmem:[#allocation7 + $0xb0] sm:$0xff] }
  0x57   :  { %747 = vmatpush3.bf16.msra.mxu1 %v746_v24  ;;  %v277_v59 = vld [vmem:[#allocation7 + $0x98] sm:$0xff]  ;;  %v770_v63 = vpack.c.bf16 %v279_v62, %v278_v61  ;;  %v282_v5 = vld [vmem:[#allocation7 + $0xc0] sm:$0xff]  ;;  %v284_v7 = vld [vmem:[#allocation7 + $0xd0] sm:$0xff] }
  0x58   :  { %748 = vmatprep.subr.bf16.mxu1 %v959_v0  ;;  %v767_v60 = vpack.c.bf16 %v277_v59, %v276_v58  ;;  %v281_v3 = vld [vmem:[#allocation7 + $0xb8] sm:$0xff]  ;;  %v286_v10 = vld [vmem:[#allocation7 + $0xe0] sm:$0xff]  ;;  %v287_v11 = vld [vmem:[#allocation7 + $0xe8] sm:$0xff] }
  0x59   :  { %726 = vmatpush3.bf16.msra.mxu0 %v725_v21  ;;  %v773_v4 = vpack.c.bf16 %v281_v3, %v280_v2  ;;  %v285_v8 = vld [vmem:[#allocation7 + $0xd8] sm:$0xff]  ;;  %v782_v12 = vpack.c.bf16 %v287_v11, %v286_v10  ;;  %v288_v13 = vld [vmem:[#allocation7 + $0xf0] sm:$0xff]  ;;  %v380_v24 = vld [vmem:[#allocation8] sm:$0xff] }
  0x5a   :  { %727 = vmatprep.subr.bf16.mxu0 %v959_v0  ;;  %v779_v9 = vpack.c.bf16 %v285_v8, %v284_v7  ;;  %v289_v14 = vld [vmem:[#allocation7 + $0xf8] sm:$0xff]  ;;  %v381_v25 = vld [vmem:[#allocation8 + $0x8] sm:$0xff]  ;;  %v382_v26 = vld [vmem:[#allocation8 + $0x10] sm:$0xff] }
  0x5b   :  { %750 = vmatpush3.bf16.msra.mxu1 %v749_v30  ;;  %v785_v15 = vpack.c.bf16 %v289_v14, %v288_v13  ;;  %v501_v16 = vld [vmem:[%s1128_s4] ss:$0 sm:$0xff]  ;;  %v384_v30 = vld [vmem:[#allocation8 + $0x20] sm:$0xff]  ;;  %v385_v31 = vld [vmem:[#allocation8 + $0x28] sm:$0xff] }
  0x5c   :  { %751 = vmatprep.subr.bf16.mxu1 %v959_v0  ;;  %v383_v28 = vld [vmem:[#allocation8 + $0x18] sm:$0xff]  ;;  %v794_v32 = vpack.c.bf16 %v385_v31, %v384_v30  ;;  %v390_v48 = vld [vmem:[#allocation8 + $0x50] sm:$0xff]  ;;  %v392_v51 = vld [vmem:[#allocation8 + $0x60] sm:$0xff] }
  0x5d   :  { %729 = vmatpush3.bf16.msra.mxu0 %v728_v27  ;;  %v788_v27 = vpack.c.bf16 %v381_v25, %v380_v24  ;;  %v791_v29 = vpack.c.bf16 %v383_v28, %v382_v26  ;;  %v387_v34 = vld [vmem:[#allocation8 + $0x38] sm:$0xff]  ;;  %v393_v52 = vld [vmem:[#allocation8 + $0x68] sm:$0xff] }
  0x5e   :  { %730 = vmatprep.subr.bf16.mxu0 %v959_v0  ;;  %v391_v49 = vld [vmem:[#allocation8 + $0x58] sm:$0xff] }
  0x5f   :  { %753 = vmatpush3.bf16.msra.mxu1 %v752_v36  ;;  %v504_v36 = vld [vmem:[%s1128_s4 + $0x1] ss:$0 sm:$0xff]  ;;  %v506_v61 = vld [vmem:[%s1130_s6] ss:$0 sm:$0xff] }
  0x60   :  { %754 = vmatprep.subr.bf16.mxu1 %v959_v0 }
  0x61   :  { %732 = vmatpush3.bf16.msra.mxu0 %v731_v33  ;;  %v386_v33 = vld [vmem:[#allocation8 + $0x30] sm:$0xff] }
  0x62   :  { %733 = vmatprep.subr.bf16.mxu0 %v959_v0  ;;  %v797_v35 = vpack.c.bf16 %v387_v34, %v386_v33 }
  0x63   :  { %756 = vmatpush3.bf16.msra.mxu1 %v755_v42 }
  0x64   :  { %757 = vmatprep.subr.bf16.mxu1 %v959_v0 }
  0x65   :  { %735 = vmatpush3.bf16.msra.mxu0 %v734_v39 }
  0x66   :  { %736 = vmatprep.subr.bf16.mxu0 %v959_v0 }
  0x67   :  { %759 = vmatpush3.bf16.msra.mxu1 %v758_v46  ;;  %v389_v46 = vld [vmem:[#allocation8 + $0x48] sm:$0xff] }
  0x68   :  { %760 = vmatprep.subr.bf16.mxu1 %v959_v0 }
  0x69   :  { %738 = vmatpush3.bf16.msra.mxu0 %v737_v45  ;;  %v388_v45 = vld [vmem:[#allocation8 + $0x40] sm:$0xff] }
  0x6a   :  { %763 = vmatprep.subr.bf16.mxu0 %v959_v0 }
  0x6b   :  { %762 = vmatpush3.bf16.msra.mxu1 %v761_v50  ;;  %v803_v50 = vpack.c.bf16 %v391_v49, %v390_v48 }
  0x6c   :  { %608 = vmatmul.mubr.f32.vlgmr.msra.gmra.mrb[0].mxu0 %v80_v47  ;;  %787 = vmatprep.subr.bf16.mxu1 %v959_v0  ;;  %v800_v47 = vpack.c.bf16 %v389_v46, %v388_v45 }
  0x6d   :  { %677 = vmatprep.mubr.msk.f32.mxu0 %vm960_vm0, %v961_v1  ;;  %765 = vmatpush3.bf16.msra.mxu0 %v764_v53  ;;  %v806_v53 = vpack.c.bf16 %v393_v52, %v392_v51 }
  0x6e   :  { %766 = vmatprep.subr.bf16.mxu0 %v959_v0 }
  0x71   :  { %768 = vmatpush3.bf16.msra.mxu0 %v767_v60 }
  0x72   :  { %769 = vmatprep.subr.bf16.mxu0 %v959_v0 }
  0x75   :  { %771 = vmatpush3.bf16.msra.mxu0 %v770_v63 }
  0x76   :  { %772 = vmatprep.subr.bf16.mxu0 %v959_v0 }
  0x79   :  { %774 = vmatpush3.bf16.msra.mxu0 %v773_v4 }
  0x7a   :  { %775 = vmatprep.subr.bf16.mxu0 %v959_v0 }
 0x13f   :  { %v170_v55 = vpop.f32.mrb[0].mxu0 }
 0x140   :  { %v171_v56 = vadd.f32 %v500_v54, %v170_v55  ;;  %v609_v57 = vpop.f32.mrb[1].mxu0  ;;  %v394_v54 = vld [vmem:[#allocation8 + $0x70] sm:$0xff]  ;;  %v395_v55 = vld [vmem:[#allocation8 + $0x78] sm:$0xff] }
 0x142   :  { %643 = vmatmul.mubr.f32.vlgmr.msra.gmra.mrb[0].mxu1 %v171_v56  ;;  %v809_v56 = vpack.c.bf16 %v395_v55, %v394_v54 }
 0x143   :  { %712 = vmatprep.mubr.msk.f32.mxu1 %vm960_vm0, %v961_v1  ;;  %v283_v1 = vld [vmem:[#allocation7 + $0xc8] sm:$0xff]  ;;  %789 = vmatpush3.bf16.msra.mxu1 %v788_v27 }
 0x144   :  { %v776_v6 = vpack.c.bf16 %v283_v1, %v282_v5  ;;  %790 = vmatprep.subr.bf16.mxu1 %v959_v0 }
 0x146   :  { %777 = vmatpush3.bf16.msra.mxu0 %v776_v6 }
 0x147   :  { %778 = vmatprep.subr.bf16.mxu0 %v959_v0  ;;  %792 = vmatpush3.bf16.msra.mxu1 %v791_v29 }
 0x148   :  { %793 = vmatprep.subr.bf16.mxu1 %v959_v0 }
 0x14a   :  { %780 = vmatpush3.bf16.msra.mxu0 %v779_v9 }
 0x14b   :  { %781 = vmatprep.subr.bf16.mxu0 %v959_v0  ;;  %795 = vmatpush3.bf16.msra.mxu1 %v794_v32 }
 0x14c   :  { %796 = vmatprep.subr.bf16.mxu1 %v959_v0 }
 0x14e   :  { %783 = vmatpush3.bf16.msra.mxu0 %v782_v12 }
 0x14f   :  { %784 = vmatprep.subr.bf16.mxu0 %v959_v0  ;;  %798 = vmatpush3.bf16.msra.mxu1 %v797_v35 }
 0x150   :  { %799 = vmatprep.subr.bf16.mxu1 %v959_v0 }
 0x152   :  { %786 = vmatpush3.bf16.msra.mxu0 %v785_v15 }
 0x153   :  { %801 = vmatpush3.bf16.msra.mxu1 %v800_v47 }
 0x154   :  { %802 = vmatprep.subr.bf16.mxu1 %v959_v0 }
 0x157   :  { %804 = vmatpush3.bf16.msra.mxu1 %v803_v50 }
 0x158   :  { %805 = vmatprep.subr.bf16.mxu1 %v959_v0 }
 0x15b   :  { %807 = vmatpush3.bf16.msra.mxu1 %v806_v53 }
 0x15c   :  { %808 = vmatprep.subr.bf16.mxu1 %v959_v0 }
 0x15f   :  { %810 = vmatpush3.bf16.msra.mxu1 %v809_v56 }
 0x215   :  { %v263_v17 = vpop.f32.mrb[0].mxu1 }
 0x216   :  { %v264_v18 = vadd.f32 %v501_v16, %v263_v17  ;;  %v644_v19 = vpop.f32.mrb[1].mxu1 }
 0x218   :  { %v502_v20 = vmul.f32 -1.442695, %v264_v18 }
 0x21a   :  { %821 = vpow2.f32 %v502_v20 }
 0x224   :  { %v822_v21 = vpop.eup %821 }
 0x225   :  { %v270_v22 = vadd.f32 1.0, %v822_v21 }
 0x227   :  { %823 = vrcp.f32 %v270_v22 }
 0x231   :  { %v824_v23 = vpop.eup %823 }
 0x232   :  { %678 = vmatmul.mubr.f32.vlgmr.msra.gmra.mrb[2].mxu0 %v824_v23 }
 0x305   :  { %v364_v37 = vpop.f32.mrb[2].mxu0 }
 0x306   :  { %v365_v38 = vadd.f32 %v504_v36, %v364_v37  ;;  %v679_v39 = vpop.f32.mrb[3].mxu0 }
 0x308   :  { %v505_v40 = vmul.f32 -1.442695, %v365_v38 }
 0x30a   :  { %825 = vpow2.f32 %v505_v40 }
 0x314   :  { %v826_v41 = vpop.eup %825 }
 0x315   :  { %v371_v42 = vadd.f32 1.0, %v826_v41 }
 0x317   :  { %827 = vrcp.f32 %v371_v42 }
 0x321   :  { %v828_v43 = vpop.eup %827 }
 0x322   :  { %v374_v44 = vmul.f32 %v828_v43, %v828_v43 }
 0x324   :  { %375 = vadd.xlane.f32.xlu0 %v374_v44 }
 0x3b1   :  { %v376_v57 = vpop.xlane.xlu0 %375 }
 0x3b2   :  { %v377_v58 = vmax.f32 %v376_v57, 1e-30 }
 0x3b4   :  { %829 = vrsqrt.f32 %v377_v58 }
 0x3be   :  { %v830_v59 = vpop.eup %829 }
 0x3bf   :  { %v379_v60 = vmul.f32 %v830_v59, %v828_v43 }
 0x3c1   :  { %713 = vmatmul.mubr.f32.vlgmr.msra.gmra.mrb[2].mxu1 %v379_v60 }
 0x494   :  { %v469_v62 = vpop.f32.mrb[2].mxu1 }
 0x495   :  { %v470_v63 = vadd.f32 %v506_v61, %v469_v62  ;;  %v714_v2 = vpop.f32.mrb[3].mxu1 }
 0x497   :  { %473 = vmax.xlane.f32.xlu0 %v470_v63 }
 0x524   :  { %v474_v3 = vpop.xlane.xlu0 %473 }
 0x525   :  { %v475_v4 = vsub.f32 %v470_v63, %v474_v3 }
 0x527   :  { %v476_v5 = vmul.f32 1.442695, %v475_v4 }
 0x529   :  { %831 = vpow2.f32 %v476_v5 }
 0x533   :  { %v832_v0 = vpop.eup %831 }
 0x534   :  { %478 = vadd.xlane.f32.xlu1 %v832_v0 }
 0x5c1   :  { %v479_v1 = vpop.xlane.xlu1 %478 }
 0x5c2   :  { %833 = vrcp.f32 %v479_v1 }
 0x5cc   :  { %v834_v6 = vpop.eup %833 }
 0x5cd   :  { %v481_v7 = vmul.f32 %v834_v6, %v832_v0 }
 0x5cf   :  { %482 = vst [vmem:[#allocation10] sm:$0xff] %v481_v7 }
 0x5d0   :  { %934 = shalt.err (!%p931_p8)
}
 0x5d1   :  { %s935_s10 = scalar_lea.hbm %s1131_s7, 128 }
 0x5d2   :  { %p936_p9 = scmp.ne.s32.totalorder %s1131_s7, %s935_s10  ;;  %p939_p10 = scmp.lt.u32.totalorder %s935_s10, %s1131_s7 }
 0x5d4   :  { %p941_p11 = pnand %p939_p10, %p936_p9 }
 0x5d6   :  { %944 = shalt.err (!%p941_p11)
}
 0x5d7   :  { %492 = dma.vmem_to_hbm [thread:$0]  %s490_s30, 128, %s1131_s7, [#allocation4]  }
 0x5d8   :  { %951 = dma.done.wait [#allocation4], 128  }
 0x5d9   :  { %952 = vsyncadd [#allocation4], 4294967168 }
 0x5da   :  { %496 = vsyncpa [#allocation3], 1 }
 0x5db   :  { %497 = vsyncpa [#allocation6], 1 }
 0x5dc   :  { %498 = vsyncpa [#allocation9], 1 }
 0x5dd   :  { %499 = vsyncpa [#allocation4], 1 }

// kernel: tpu_custom_call.1
= control target key start
LH: loop header
LB: loop body
LE: loop exit
PB: predicated region body
PF: predicated region fallthrough
CT: control target
= control target key end

     0   :  { %12 = vsyncpa [#allocation3], 0  ;;  %s1124_s0 = inlined_call_operand.hbm [shape: f32[8,128], index: 0, kind: input, shape index: {}]   ;;  %s1125_s1 = inlined_call_operand.hbm [shape: f32[128,128], index: 1, kind: input, shape index: {}]   ;;  %s1126_s2 = inlined_call_operand.vmem [shape: f32[1,128], index: 2, kind: input, shape index: {}]   ;;  %s1127_s3 = inlined_call_operand.hbm [shape: f32[2,128,128], index: 3, kind: input, shape index: {}]   ;;  %s1128_s4 = inlined_call_operand.vmem [shape: f32[2,1,128], index: 4, kind: input, shape index: {}]   ;;  %s1129_s5 = inlined_call_operand.hbm [shape: f32[128,128], index: 5, kind: input, shape index: {}]   ;;  %s1130_s6 = inlined_call_operand.vmem [shape: f32[1,128], index: 6, kind: input, shape index: {}]   ;;  %s1131_s7 = inlined_call_operand.hbm [shape: f32[8,128], index: 7, kind: output, shape index: {}]  }
   0x1   :  { %13 = vsyncpa [#allocation6], 0 }
   0x2   :  { %14 = vsyncpa [#allocation9], 0 }
   0x3   :  { %15 = vsyncpa [#allocation4], 0  ;;  %s953_s24 = smov [#allocation5]   ;;  %s835_s28 = scalar_lea.hbm %s1125_s1, 2048 }
   0x4   :  { %s31_s25 = sshll.u32 %s953_s24, 4  ;;  %p836_p0 = scmp.ne.s32.totalorder %s1125_s1, %s835_s28  ;;  %s32_s25 = int_to_ptr.vmem [resolvable:$true] %s31_s25 }
   0x5   :  { %p839_p1 = scmp.lt.u32.totalorder %s835_s28, %s1125_s1 }
   0x7   :  { %p841_p2 = pnand %p839_p1, %p836_p0 }
   0x9   :  { %844 = shalt.err (!%p841_p2)
}
   0xa   :  { %s845_s10 = scalar_lea.vmem %s32_s25, 2048  ;;  %p850_p4 = scmp.lt.s32.totalorder %s32_s25, %s32_s25 }
   0xb   :  { %p846_p3 = scmp.ne.s32.totalorder %s32_s25, %s845_s10  ;;  %p851_p5 = scmp.lt.s32.totalorder %s845_s10, %s845_s10 }
   0xd   :  { %p852_p6 = por %p851_p5, %p850_p4 }
   0xf   :  { %p853_p7 = pnand %p852_p6, %p846_p3 }
  0x11   :  { %856 = shalt.err (!%p853_p7)
}
  0x12   :  { %s954_s11 = smov 128   ;;  %s955_s12 = smov 8  }
  0x13   :  { %37 = dma.hbm_to_vmem [thread:$0]  %s1125_s1, 2048, %s32_s25, [#allocation6], %s954_s11, %s954_s11, %s955_s12  }
  0x14   :  { %s956_s15 = smov [#allocation2]   ;;  %s957_s17 = smov [#allocation7]  }
  0x15   :  { %s22_s16 = sshll.u32 %s956_s15, 4  ;;  %s45_s18 = sshll.u32 %s957_s17, 4  ;;  %s23_s16 = int_to_ptr.vmem [resolvable:$true] %s22_s16  ;;  %s46_s18 = int_to_ptr.vmem [resolvable:$true] %s45_s18 }
  0x16   :  { %s857_s21 = scalar_lea.hbm %s1124_s0, 128 }
  0x17   :  { %p858_p8 = scmp.ne.s32.totalorder %s1124_s0, %s857_s21  ;;  %p861_p9 = scmp.lt.u32.totalorder %s857_s21, %s1124_s0 }
  0x19   :  { %p863_p10 = pnand %p861_p9, %p858_p8 }
  0x1b   :  { %866 = shalt.err (!%p863_p10)
}
  0x1c   :  { %s867_s1 = scalar_lea.vmem %s23_s16, 128  ;;  %p872_p12 = scmp.lt.s32.totalorder %s23_s16, %s23_s16 }
  0x1d   :  { %p868_p11 = scmp.ne.s32.totalorder %s23_s16, %s867_s1  ;;  %p873_p13 = scmp.lt.s32.totalorder %s867_s1, %s867_s1 }
  0x1f   :  { %p874_p0 = por %p873_p13, %p872_p12 }
  0x21   :  { %p875_p1 = pnand %p874_p0, %p868_p11 }
  0x23   :  { %878 = shalt.err (!%p875_p1)
}
  0x24   :  { %25 = dma.hbm_to_vmem [thread:$0]  %s1124_s0, 128, %s23_s16, [#allocation3]  }
  0x25   :  { %s879_s30 = scalar_lea.hbm %s1127_s3, 4096 }
  0x26   :  { %p880_p2 = scmp.ne.s32.totalorder %s1127_s3, %s879_s30  ;;  %p883_p3 = scmp.lt.u32.totalorder %s879_s30, %s1127_s3 }
  0x28   :  { %p885_p4 = pnand %p883_p3, %p880_p2 }
  0x2a   :  { %888 = shalt.err (!%p885_p4)
}
  0x2b   :  { %s889_s14 = scalar_lea.vmem %s46_s18, 4096  ;;  %p894_p6 = scmp.lt.s32.totalorder %s46_s18, %s46_s18 }
  0x2c   :  { %p890_p5 = scmp.ne.s32.totalorder %s46_s18, %s889_s14  ;;  %p895_p7 = scmp.lt.s32.totalorder %s889_s14, %s889_s14 }
  0x2e   :  { %p896_p8 = por %p895_p7, %p894_p6 }
  0x30   :  { %p897_p9 = pnand %p896_p8, %p890_p5 }
  0x32   :  { %900 = shalt.err (!%p897_p9)
}
  0x33   :  { %51 = dma.hbm_to_vmem [thread:$0]  %s1127_s3, 4096, %s46_s18, [#allocation6], %s954_s11, %s954_s11, %s955_s12  }
  0x34   :  { %s958_s16 = smov [#allocation8]   ;;  %s901_s21 = scalar_lea.hbm %s1129_s5, 2048 }
  0x35   :  { %s59_s17 = sshll.u32 %s958_s16, 4  ;;  %p902_p10 = scmp.ne.s32.totalorder %s1129_s5, %s901_s21  ;;  %s60_s17 = int_to_ptr.vmem [resolvable:$true] %s59_s17 }
  0x36   :  { %p905_p11 = scmp.lt.u32.totalorder %s901_s21, %s1129_s5 }
  0x38   :  { %p907_p12 = pnand %p905_p11, %p902_p10 }
  0x3a   :  { %910 = shalt.err (!%p907_p12)
}
  0x3b   :  { %s911_s1 = scalar_lea.vmem %s60_s17, 2048  ;;  %p916_p0 = scmp.lt.s32.totalorder %s60_s17, %s60_s17 }
  0x3c   :  { %p912_p13 = scmp.ne.s32.totalorder %s60_s17, %s911_s1  ;;  %p917_p1 = scmp.lt.s32.totalorder %s911_s1, %s911_s1 }
  0x3e   :  { %p918_p2 = por %p917_p1, %p916_p0 }
  0x40   :  { %p919_p3 = pnand %p918_p2, %p912_p13 }
  0x42   :  { %922 = shalt.err (!%p919_p3)
}
  0x43   :  { %65 = dma.hbm_to_vmem [thread:$0]  %s1129_s5, 2048, %s60_s17, [#allocation9], %s954_s11, %s954_s11, %s955_s12  }
  0x44   :  { %945 = dma.done.wait [#allocation3], 128  }
  0x45   :  { %946 = vsyncadd [#allocation3], 4294967168 }
  0x46   :  { %947 = dma.done.wait [#allocation6], 6144  }
  0x47   :  { %948 = vsyncadd [#allocation6], 4294961152 }
  0x48   :  { %949 = dma.done.wait [#allocation9], 2048  }
  0x49   :  { %950 = vsyncadd [#allocation9], 4294965248  ;;  %v959_v0 = vmov 0.0|0.0   ;;  %vm960_vm0 = vmmov 0   ;;  %v961_v1 = vmov 0.0   ;;  %v81_v2 = vld [vmem:[#allocation5] sm:$0xff] }
  0x4a   :  { %715 = vmatprep.subr.bf16.mxu0 %v959_v0  ;;  %607 = vmatprep.mubr.msk.f32.mxu0 %vm960_vm0, %v961_v1  ;;  %v82_v3 = vld [vmem:[#allocation5 + $0x8] sm:$0xff]  ;;  %v83_v4 = vld [vmem:[#allocation5 + $0x10] sm:$0xff]  ;;  %v84_v6 = vld [vmem:[#allocation5 + $0x18] sm:$0xff]  ;;  %s962_s29 = smov [#allocation10]  }
  0x4b   :  { %739 = vmatprep.subr.bf16.mxu1 %v959_v0  ;;  %642 = vmatprep.mubr.msk.f32.mxu1 %vm960_vm0, %v961_v1  ;;  %v716_v5 = vpack.c.bf16 %v82_v3, %v81_v2  ;;  %v719_v7 = vpack.c.bf16 %v84_v6, %v83_v4  ;;  %v85_v8 = vld [vmem:[#allocation5 + $0x20] sm:$0xff]  ;;  %v86_v9 = vld [vmem:[#allocation5 + $0x28] sm:$0xff]  ;;  %v176_v12 = vld [vmem:[#allocation7 + $0x10] sm:$0xff]  ;;  %s489_s30 = sshll.u32 %s962_s29, 4  ;;  %s490_s30 = int_to_ptr.vmem [resolvable:$true] %s489_s30 }
  0x4c   :  { %v174_v10 = vld [vmem:[#allocation7] sm:$0xff]  ;;  %v175_v11 = vld [vmem:[#allocation7 + $0x8] sm:$0xff]  ;;  %v177_v13 = vld [vmem:[#allocation7 + $0x18] sm:$0xff]  ;;  %v722_v14 = vpack.c.bf16 %v86_v9, %v85_v8  ;;  %s923_s8 = scalar_lea.vmem %s490_s30, 128  ;;  %p928_p5 = scmp.lt.s32.totalorder %s490_s30, %s490_s30 }
  0x4d   :  { %717 = vmatpush3.bf16.msra.mxu0 %v716_v5  ;;  %v740_v15 = vpack.c.bf16 %v175_v11, %v174_v10  ;;  %v87_v16 = vld [vmem:[#allocation5 + $0x30] sm:$0xff]  ;;  %v88_v17 = vld [vmem:[#allocation5 + $0x38] sm:$0xff]  ;;  %v743_v18 = vpack.c.bf16 %v177_v13, %v176_v12  ;;  %v178_v19 = vld [vmem:[#allocation7 + $0x20] sm:$0xff]  ;;  %p924_p4 = scmp.ne.s32.totalorder %s490_s30, %s923_s8  ;;  %p929_p6 = scmp.lt.s32.totalorder %s923_s8, %s923_s8 }
  0x4e   :  { %718 = vmatprep.subr.bf16.mxu0 %v959_v0  ;;  %v179_v20 = vld [vmem:[#allocation7 + $0x28] sm:$0xff]  ;;  %v725_v21 = vpack.c.bf16 %v88_v17, %v87_v16  ;;  %v89_v22 = vld [vmem:[#allocation5 + $0x40] sm:$0xff]  ;;  %v180_v25 = vld [vmem:[#allocation7 + $0x30] sm:$0xff] }
  0x4f   :  { %741 = vmatpush3.bf16.msra.mxu1 %v740_v15  ;;  %v90_v23 = vld [vmem:[#allocation5 + $0x48] sm:$0xff]  ;;  %v746_v24 = vpack.c.bf16 %v179_v20, %v178_v19  ;;  %v181_v26 = vld [vmem:[#allocation7 + $0x38] sm:$0xff]  ;;  %v91_v28 = vld [vmem:[#allocation5 + $0x50] sm:$0xff]  ;;  %p930_p7 = por %p929_p6, %p928_p5 }
  0x50   :  { %742 = vmatprep.subr.bf16.mxu1 %v959_v0  ;;  %v728_v27 = vpack.c.bf16 %v90_v23, %v89_v22  ;;  %v92_v29 = vld [vmem:[#allocation5 + $0x58] sm:$0xff]  ;;  %v749_v30 = vpack.c.bf16 %v181_v26, %v180_v25  ;;  %v182_v31 = vld [vmem:[#allocation7 + $0x40] sm:$0xff]  ;;  %v183_v32 = vld [vmem:[#allocation7 + $0x48] sm:$0xff] }
  0x51   :  { %720 = vmatpush3.bf16.msra.mxu0 %v719_v7  ;;  %v731_v33 = vpack.c.bf16 %v92_v29, %v91_v28  ;;  %v93_v34 = vld [vmem:[#allocation5 + $0x60] sm:$0xff]  ;;  %v94_v35 = vld [vmem:[#allocation5 + $0x68] sm:$0xff]  ;;  %v752_v36 = vpack.c.bf16 %v183_v32, %v182_v31  ;;  %v184_v37 = vld [vmem:[#allocation7 + $0x50] sm:$0xff]  ;;  %p931_p8 = pnand %p930_p7, %p924_p4 }
  0x52   :  { %721 = vmatprep.subr.bf16.mxu0 %v959_v0  ;;  %v185_v38 = vld [vmem:[#allocation7 + $0x58] sm:$0xff]  ;;  %v734_v39 = vpack.c.bf16 %v94_v35, %v93_v34  ;;  %v95_v40 = vld [vmem:[#allocation5 + $0x70] sm:$0xff]  ;;  %v186_v43 = vld [vmem:[#allocation7 + $0x60] sm:$0xff] }
  0x53   :  { %744 = vmatpush3.bf16.msra.mxu1 %v743_v18  ;;  %v96_v41 = vld [vmem:[#allocation5 + $0x78] sm:$0xff]  ;;  %v755_v42 = vpack.c.bf16 %v185_v38, %v184_v37  ;;  %v187_v44 = vld [vmem:[#allocation7 + $0x68] sm:$0xff]  ;;  %v188_v48 = vld [vmem:[#allocation7 + $0x70] sm:$0xff] }
  0x54   :  { %745 = vmatprep.subr.bf16.mxu1 %v959_v0  ;;  %v737_v45 = vpack.c.bf16 %v96_v41, %v95_v40  ;;  %v758_v46 = vpack.c.bf16 %v187_v44, %v186_v43  ;;  %v80_v47 = vld [vmem:[#allocation2] sm:$0xff]  ;;  %v274_v51 = vld [vmem:[#allocation7 + $0x80] sm:$0xff]  ;;  %v275_v52 = vld [vmem:[#allocation7 + $0x88] sm:$0xff] }
  0x55   :  { %723 = vmatpush3.bf16.msra.mxu0 %v722_v14  ;;  %v189_v49 = vld [vmem:[#allocation7 + $0x78] sm:$0xff]  ;;  %v764_v53 = vpack.c.bf16 %v275_v52, %v274_v51  ;;  %v276_v58 = vld [vmem:[#allocation7 + $0x90] sm:$0xff]  ;;  %v278_v61 = vld [vmem:[#allocation7 + $0xa0] sm:$0xff] }
  0x56   :  { %724 = vmatprep.subr.bf16.mxu0 %v959_v0  ;;  %v761_v50 = vpack.c.bf16 %v189_v49, %v188_v48  ;;  %v500_v54 = vld [vmem:[%s1126_s2] ss:$0 sm:$0xff]  ;;  %v279_v62 = vld [vmem:[#allocation7 + $0xa8] sm:$0xff]  ;;  %v280_v2 = vld [vmem:[#allocation7 + $0xb0] sm:$0xff] }
  0x57   :  { %747 = vmatpush3.bf16.msra.mxu1 %v746_v24  ;;  %v277_v59 = vld [vmem:[#allocation7 + $0x98] sm:$0xff]  ;;  %v770_v63 = vpack.c.bf16 %v279_v62, %v278_v61  ;;  %v282_v5 = vld [vmem:[#allocation7 + $0xc0] sm:$0xff]  ;;  %v284_v7 = vld [vmem:[#allocation7 + $0xd0] sm:$0xff] }
  0x58   :  { %748 = vmatprep.subr.bf16.mxu1 %v959_v0  ;;  %v767_v60 = vpack.c.bf16 %v277_v59, %v276_v58  ;;  %v281_v3 = vld [vmem:[#allocation7 + $0xb8] sm:$0xff]  ;;  %v286_v10 = vld [vmem:[#allocation7 + $0xe0] sm:$0xff]  ;;  %v287_v11 = vld [vmem:[#allocation7 + $0xe8] sm:$0xff] }
  0x59   :  { %726 = vmatpush3.bf16.msra.mxu0 %v725_v21  ;;  %v773_v4 = vpack.c.bf16 %v281_v3, %v280_v2  ;;  %v285_v8 = vld [vmem:[#allocation7 + $0xd8] sm:$0xff]  ;;  %v782_v12 = vpack.c.bf16 %v287_v11, %v286_v10  ;;  %v288_v13 = vld [vmem:[#allocation7 + $0xf0] sm:$0xff]  ;;  %v380_v24 = vld [vmem:[#allocation8] sm:$0xff] }
  0x5a   :  { %727 = vmatprep.subr.bf16.mxu0 %v959_v0  ;;  %v779_v9 = vpack.c.bf16 %v285_v8, %v284_v7  ;;  %v289_v14 = vld [vmem:[#allocation7 + $0xf8] sm:$0xff]  ;;  %v381_v25 = vld [vmem:[#allocation8 + $0x8] sm:$0xff]  ;;  %v382_v26 = vld [vmem:[#allocation8 + $0x10] sm:$0xff] }
  0x5b   :  { %750 = vmatpush3.bf16.msra.mxu1 %v749_v30  ;;  %v785_v15 = vpack.c.bf16 %v289_v14, %v288_v13  ;;  %v501_v16 = vld [vmem:[%s1128_s4] ss:$0 sm:$0xff]  ;;  %v384_v30 = vld [vmem:[#allocation8 + $0x20] sm:$0xff]  ;;  %v385_v31 = vld [vmem:[#allocation8 + $0x28] sm:$0xff] }
  0x5c   :  { %751 = vmatprep.subr.bf16.mxu1 %v959_v0  ;;  %v383_v28 = vld [vmem:[#allocation8 + $0x18] sm:$0xff]  ;;  %v794_v32 = vpack.c.bf16 %v385_v31, %v384_v30  ;;  %v390_v48 = vld [vmem:[#allocation8 + $0x50] sm:$0xff]  ;;  %v392_v51 = vld [vmem:[#allocation8 + $0x60] sm:$0xff] }
  0x5d   :  { %729 = vmatpush3.bf16.msra.mxu0 %v728_v27  ;;  %v788_v27 = vpack.c.bf16 %v381_v25, %v380_v24  ;;  %v791_v29 = vpack.c.bf16 %v383_v28, %v382_v26  ;;  %v387_v34 = vld [vmem:[#allocation8 + $0x38] sm:$0xff]  ;;  %v393_v52 = vld [vmem:[#allocation8 + $0x68] sm:$0xff] }
  0x5e   :  { %730 = vmatprep.subr.bf16.mxu0 %v959_v0  ;;  %v391_v49 = vld [vmem:[#allocation8 + $0x58] sm:$0xff] }
  0x5f   :  { %753 = vmatpush3.bf16.msra.mxu1 %v752_v36  ;;  %v504_v36 = vld [vmem:[%s1128_s4 + $0x1] ss:$0 sm:$0xff]  ;;  %v506_v61 = vld [vmem:[%s1130_s6] ss:$0 sm:$0xff] }
  0x60   :  { %754 = vmatprep.subr.bf16.mxu1 %v959_v0 }
  0x61   :  { %732 = vmatpush3.bf16.msra.mxu0 %v731_v33  ;;  %v386_v33 = vld [vmem:[#allocation8 + $0x30] sm:$0xff] }
  0x62   :  { %733 = vmatprep.subr.bf16.mxu0 %v959_v0  ;;  %v797_v35 = vpack.c.bf16 %v387_v34, %v386_v33 }
  0x63   :  { %756 = vmatpush3.bf16.msra.mxu1 %v755_v42 }
  0x64   :  { %757 = vmatprep.subr.bf16.mxu1 %v959_v0 }
  0x65   :  { %735 = vmatpush3.bf16.msra.mxu0 %v734_v39 }
  0x66   :  { %736 = vmatprep.subr.bf16.mxu0 %v959_v0 }
  0x67   :  { %759 = vmatpush3.bf16.msra.mxu1 %v758_v46  ;;  %v389_v46 = vld [vmem:[#allocation8 + $0x48] sm:$0xff] }
  0x68   :  { %760 = vmatprep.subr.bf16.mxu1 %v959_v0 }
  0x69   :  { %738 = vmatpush3.bf16.msra.mxu0 %v737_v45  ;;  %v388_v45 = vld [vmem:[#allocation8 + $0x40] sm:$0xff] }
  0x6a   :  { %763 = vmatprep.subr.bf16.mxu0 %v959_v0 }
  0x6b   :  { %762 = vmatpush3.bf16.msra.mxu1 %v761_v50  ;;  %v803_v50 = vpack.c.bf16 %v391_v49, %v390_v48 }
  0x6c   :  { %608 = vmatmul.mubr.f32.vlgmr.msra.gmra.mrb[0].mxu0 %v80_v47  ;;  %787 = vmatprep.subr.bf16.mxu1 %v959_v0  ;;  %v800_v47 = vpack.c.bf16 %v389_v46, %v388_v45 }
  0x6d   :  { %677 = vmatprep.mubr.msk.f32.mxu0 %vm960_vm0, %v961_v1  ;;  %765 = vmatpush3.bf16.msra.mxu0 %v764_v53  ;;  %v806_v53 = vpack.c.bf16 %v393_v52, %v392_v51 }
  0x6e   :  { %766 = vmatprep.subr.bf16.mxu0 %v959_v0 }
  0x71   :  { %768 = vmatpush3.bf16.msra.mxu0 %v767_v60 }
  0x72   :  { %769 = vmatprep.subr.bf16.mxu0 %v959_v0 }
  0x75   :  { %771 = vmatpush3.bf16.msra.mxu0 %v770_v63 }
  0x76   :  { %772 = vmatprep.subr.bf16.mxu0 %v959_v0 }
  0x79   :  { %774 = vmatpush3.bf16.msra.mxu0 %v773_v4 }
  0x7a   :  { %775 = vmatprep.subr.bf16.mxu0 %v959_v0 }
 0x13f   :  { %v170_v55 = vpop.f32.mrb[0].mxu0 }
 0x140   :  { %v171_v56 = vadd.f32 %v500_v54, %v170_v55  ;;  %v609_v57 = vpop.f32.mrb[1].mxu0  ;;  %v394_v54 = vld [vmem:[#allocation8 + $0x70] sm:$0xff]  ;;  %v395_v55 = vld [vmem:[#allocation8 + $0x78] sm:$0xff] }
 0x142   :  { %643 = vmatmul.mubr.f32.vlgmr.msra.gmra.mrb[0].mxu1 %v171_v56  ;;  %v809_v56 = vpack.c.bf16 %v395_v55, %v394_v54 }
 0x143   :  { %712 = vmatprep.mubr.msk.f32.mxu1 %vm960_vm0, %v961_v1  ;;  %v283_v1 = vld [vmem:[#allocation7 + $0xc8] sm:$0xff]  ;;  %789 = vmatpush3.bf16.msra.mxu1 %v788_v27 }
 0x144   :  { %v776_v6 = vpack.c.bf16 %v283_v1, %v282_v5  ;;  %790 = vmatprep.subr.bf16.mxu1 %v959_v0 }
 0x146   :  { %777 = vmatpush3.bf16.msra.mxu0 %v776_v6 }
 0x147   :  { %778 = vmatprep.subr.bf16.mxu0 %v959_v0  ;;  %792 = vmatpush3.bf16.msra.mxu1 %v791_v29 }
 0x148   :  { %793 = vmatprep.subr.bf16.mxu1 %v959_v0 }
 0x14a   :  { %780 = vmatpush3.bf16.msra.mxu0 %v779_v9 }
 0x14b   :  { %781 = vmatprep.subr.bf16.mxu0 %v959_v0  ;;  %795 = vmatpush3.bf16.msra.mxu1 %v794_v32 }
 0x14c   :  { %796 = vmatprep.subr.bf16.mxu1 %v959_v0 }
 0x14e   :  { %783 = vmatpush3.bf16.msra.mxu0 %v782_v12 }
 0x14f   :  { %784 = vmatprep.subr.bf16.mxu0 %v959_v0  ;;  %798 = vmatpush3.bf16.msra.mxu1 %v797_v35 }
 0x150   :  { %799 = vmatprep.subr.bf16.mxu1 %v959_v0 }
 0x152   :  { %786 = vmatpush3.bf16.msra.mxu0 %v785_v15 }
 0x153   :  { %801 = vmatpush3.bf16.msra.mxu1 %v800_v47 }
 0x154   :  { %802 = vmatprep.subr.bf16.mxu1 %v959_v0 }
 0x157   :  { %804 = vmatpush3.bf16.msra.mxu1 %v803_v50 }
 0x158   :  { %805 = vmatprep.subr.bf16.mxu1 %v959_v0 }
 0x15b   :  { %807 = vmatpush3.bf16.msra.mxu1 %v806_v53 }
 0x15c   :  { %808 = vmatprep.subr.bf16.mxu1 %v959_v0 }
 0x15f   :  { %810 = vmatpush3.bf16.msra.mxu1 %v809_v56 }
 0x215   :  { %v263_v17 = vpop.f32.mrb[0].mxu1 }
 0x216   :  { %v264_v18 = vadd.f32 %v501_v16, %v263_v17  ;;  %v644_v19 = vpop.f32.mrb[1].mxu1 }
 0x218   :  { %v502_v20 = vmul.f32 -1.442695, %v264_v18 }
 0x21a   :  { %821 = vpow2.f32 %v502_v20 }
 0x224   :  { %v822_v21 = vpop.eup %821 }
 0x225   :  { %v270_v22 = vadd.f32 1.0, %v822_v21 }
 0x227   :  { %823 = vrcp.f32 %v270_v22 }
 0x231   :  { %v824_v23 = vpop.eup %823 }
 0x232   :  { %678 = vmatmul.mubr.f32.vlgmr.msra.gmra.mrb[2].mxu0 %v824_v23 }
 0x305   :  { %v364_v37 = vpop.f32.mrb[2].mxu0 }
 0x306   :  { %v365_v38 = vadd.f32 %v504_v36, %v364_v37  ;;  %v679_v39 = vpop.f32.mrb[3].mxu0 }
 0x308   :  { %v505_v40 = vmul.f32 -1.442695, %v365_v38 }
 0x30a   :  { %825 = vpow2.f32 %v505_v40 }
 0x314   :  { %v826_v41 = vpop.eup %825 }
 0x315   :  { %v371_v42 = vadd.f32 1.0, %v826_v41 }
 0x317   :  { %827 = vrcp.f32 %v371_v42 }
 0x321   :  { %v828_v43 = vpop.eup %827 }
 0x322   :  { %v374_v44 = vmul.f32 %v828_v43, %v828_v43 }
 0x324   :  { %375 = vadd.xlane.f32.xlu0 %v374_v44 }
 0x3b1   :  { %v376_v57 = vpop.xlane.xlu0 %375 }
 0x3b2   :  { %v377_v58 = vmax.f32 %v376_v57, 1e-30 }
 0x3b4   :  { %829 = vrsqrt.f32 %v377_v58 }
 0x3be   :  { %v830_v59 = vpop.eup %829 }
 0x3bf   :  { %v379_v60 = vmul.f32 %v830_v59, %v828_v43 }
 0x3c1   :  { %713 = vmatmul.mubr.f32.vlgmr.msra.gmra.mrb[2].mxu1 %v379_v60 }
 0x494   :  { %v469_v62 = vpop.f32.mrb[2].mxu1 }
 0x495   :  { %v470_v63 = vadd.f32 %v506_v61, %v469_v62  ;;  %v714_v2 = vpop.f32.mrb[3].mxu1 }
 0x497   :  { %473 = vmax.xlane.f32.xlu0 %v470_v63 }
 0x524   :  { %v474_v3 = vpop.xlane.xlu0 %473 }
 0x525   :  { %v475_v4 = vsub.f32 %v470_v63, %v474_v3 }
 0x527   :  { %v476_v5 = vmul.f32 1.442695, %v475_v4 }
 0x529   :  { %831 = vpow2.f32 %v476_v5 }
 0x533   :  { %v832_v0 = vpop.eup %831 }
 0x534   :  { %478 = vadd.xlane.f32.xlu1 %v832_v0 }
 0x5c1   :  { %v479_v1 = vpop.xlane.xlu1 %478 }
 0x5c2   :  { %833 = vrcp.f32 %v479_v1 }
 0x5cc   :  { %v834_v6 = vpop.eup %833 }
 0x5cd   :  { %v481_v7 = vmul.f32 %v834_v6, %v832_v0 }
 0x5cf   :  { %482 = vst [vmem:[#allocation10] sm:$0xff] %v481_v7 }
 0x5d0   :  { %934 = shalt.err (!%p931_p8)
}
 0x5d1   :  { %s935_s10 = scalar_lea.hbm %s1131_s7, 128 }
 0x5d2   :  { %p936_p9 = scmp.ne.s32.totalorder %s1131_s7, %s935_s10  ;;  %p939_p10 = scmp.lt.u32.totalorder %s935_s10, %s1131_s7 }
 0x5d4   :  { %p941_p11 = pnand %p939_p10, %p936_p9 }
 0x5d6   :  { %944 = shalt.err (!%p941_p11)
}
 0x5d7   :  { %492 = dma.vmem_to_hbm [thread:$0]  %s490_s30, 128, %s1131_s7, [#allocation4]  }
 0x5d8   :  { %951 = dma.done.wait [#allocation4], 128  }
 0x5d9   :  { %952 = vsyncadd [#allocation4], 4294967168 }
 0x5da   :  { %496 = vsyncpa [#allocation3], 1 }
 0x5db   :  { %497 = vsyncpa [#allocation6], 1 }
 0x5dc   :  { %498 = vsyncpa [#allocation9], 1 }
 0x5dd   :  { %499 = vsyncpa [#allocation4], 1 }

</bundles_post_ra>
